<compile_context>
chip_gen: v7x
topology: tpu7x:2x2x1
jax: 0.10.0
libtpu: 0.0.40
codegen_flags: <defaults>
</compile_context>

<pallas_src>
import functools

import jax
import jax.numpy as jnp
from jax import lax
from jax.experimental import pallas as pl
from jax.experimental.pallas import tpu as pltpu


def _supports_bf16_elementwise():
    """bf16 VPU/EUP exists on v6e and later; v5e/v5p/v4 don't have it."""
    try:
        kind = jax.devices()[0].device_kind.lower()
    except Exception:
        return False
    return ("v6" in kind) or ("v7" in kind) or ("trillium" in kind)


def _mlp_critic_kernel(obs_ref, w1t_ref, b1_ref, w2t_ref, b2_ref, w3_ref, b3_ref,
                       out_ref, *, elementwise_bf16):
    bf16 = jnp.bfloat16

    # Layer 1 — batch on the lane axis:
    #   (H1, obs_dim) x (TILE_B, obs_dim)^T -> (H1, TILE_B), f32 accumulation on the MXU.
    h = lax.dot_general(
        w1t_ref[...],                            # bf16 weights (pre-cast in wrapper)
        obs_ref[...].astype(bf16),               # obs streamed f32 -> bf16 MXU input
        dimension_numbers=(((1,), (1,)), ((), ())),
        preferred_element_type=jnp.float32,
    )
    if elementwise_bf16:
        h = jnp.tanh(h.astype(bf16) + b1_ref[...])        # bf16 VPU/EUP (v6e/v7x)
    else:
        h = jnp.tanh(h + b1_ref[...]).astype(bf16)        # f32 VPU/EUP (v5e)

    # Layer 2: (H2, H1) @ (H1, TILE_B) -> (H2, TILE_B)
    h = jnp.dot(w2t_ref[...], h, preferred_element_type=jnp.float32)
    if elementwise_bf16:
        h = jnp.tanh(h.astype(bf16) + b2_ref[...])
    else:
        h = jnp.tanh(h + b2_ref[...]).astype(bf16)

    # Output layer: (1, H2) @ (H2, TILE_B) -> (1, TILE_B), already lane-dense.
    v = jnp.dot(w3_ref[...], h, preferred_element_type=jnp.float32)
    out_ref[...] = (v + b3_ref[0, 0]).astype(out_ref.dtype)  # scalar bias from SMEM


def mlp_critic_forward(obs, params, *, tile_b=8192, elementwise_bf16=None):
    """obs: (B, obs_dim) float32. params: w1,b1,w2,b2,w3,b3. Returns value estimates (B,)."""
    B, obs_dim = obs.shape
    w1, b1 = params["w1"], params["b1"]
    w2, b2 = params["w2"], params["b2"]
    w3, b3 = params["w3"], params["b3"]
    H1 = w1.shape[1]
    H2 = w2.shape[1]

    if elementwise_bf16 is None:
        elementwise_bf16 = _supports_bf16_elementwise()

    bf16 = jnp.bfloat16
    ew_dtype = bf16 if elementwise_bf16 else jnp.float32

    # One-time parameter prep (tiny): transpose weights so activations keep the batch on
    # the 128-lane axis, and pre-cast constants to bf16 so the kernel never re-casts them.
    w1t = w1.T.astype(bf16)                       # (H1, obs_dim)
    w2t = w2.T.astype(bf16)                       # (H2, H1)
    w3r = w3.reshape(1, H2).astype(bf16)          # (1, H2) row of the last Linear
    b1c = b1.reshape(H1, 1).astype(ew_dtype)      # (H1, 1), broadcasts over lanes
    b2c = b2.reshape(H2, 1).astype(ew_dtype)      # (H2, 1)
    b3s = b3.reshape(1, 1).astype(jnp.float32)    # scalar -> SMEM

    # Batch tile: big enough to amortize per-step overhead and give long obs DMAs, small
    # enough for double-buffer headroom against v7x's 64 MiB VMEM (obs tile (8192,16) f32
    # lane-pads to ~4 MiB per buffer). One tile equal to the full batch is always legal.
    if B <= tile_b:
        tile_b = B
    else:
        assert tile_b % 128 == 0, "tile_b must be a multiple of 128 when tiling the batch"
    num_tiles = pl.cdiv(B, tile_b)

    def resident(shape):
        # Constant block index -> stays resident in VMEM across all grid steps.
        return pl.BlockSpec(shape, lambda i: (0, 0))

    cost = pl.CostEstimate(
        flops=2 * B * (obs_dim * H1 + H1 * H2 + H2),
        transcendentals=B * (H1 + H2),
        bytes_accessed=4 * B * obs_dim + 4 * B
        + 2 * (obs_dim * H1 + H1 * H2 + H2) + 4 * (H1 + H2 + 1),
    )

    kernel = functools.partial(_mlp_critic_kernel, elementwise_bf16=elementwise_bf16)

    out = pl.pallas_call(
        kernel,
        out_shape=jax.ShapeDtypeStruct((num_tiles, tile_b), jnp.float32),
        grid=(num_tiles,),
        in_specs=[
            pl.BlockSpec((tile_b, obs_dim), lambda i: (i, 0)),    # obs: streamed per tile
            resident((H1, obs_dim)), resident((H1, 1)),           # w1^T, b1 (resident)
            resident((H2, H1)), resident((H2, 1)),                # w2^T, b2 (resident)
            resident((1, H2)),                                    # w3 row   (resident)
            pl.BlockSpec(memory_space=pltpu.MemorySpace.SMEM),    # b3 scalar in SMEM
        ],
        out_specs=pl.BlockSpec((1, tile_b), lambda i: (i, 0)),    # lane-dense output rows
        compiler_params=pltpu.CompilerParams(
            dimension_semantics=("parallel",),    # shard batch tiles across TCs (v7x)
            vmem_limit_bytes=32 * 1024 * 1024,
        ),
        cost_estimate=cost,
    )(obs, w1t, b1c, w2t, b2c, w3r, b3s)

    # Rows of (num_tiles, tile_b) are consecutive batch chunks; drop grid padding.
    # This is torch.squeeze(v, -1): result shape (B,).
    return out.reshape(-1)[:B]


def init_params(key, obs_dim, hidden_sizes):
    """Deterministic init matching the Linear shapes of MLP([obs_dim] + hidden + [1])."""
    sizes = [obs_dim] + list(hidden_sizes) + [1]
    keys = jax.random.split(key, len(sizes) - 1)
    params = {}
    for i, (fan_in, fan_out) in enumerate(zip(sizes[:-1], sizes[1:]), start=1):
        bound = 1.0 / jnp.sqrt(fan_in)
        # weight stored as (in, out) so x @ W == torch's x @ W.T
        params[f"w{i}"] = jax.random.uniform(
            keys[i - 1], (fan_in, fan_out), jnp.float32, -bound, bound
        )
        params[f"b{i}"] = jax.random.uniform(
            jax.random.fold_in(keys[i - 1], 1), (1, fan_out), jnp.float32, -bound, bound
        )
    return params


if __name__ == "__main__":
    key = jax.random.PRNGKey(0)

    # Small shapes implied by the module: batch=8, obs_dim=16, hidden_sizes=[32, 32]
    B, obs_dim = 8, 16
    hidden_sizes = [32, 32]  # activation = Tanh (standard for actor-critic MLPs)

    k_obs, k_par = jax.random.split(key)
    obs = jax.random.normal(k_obs, (B, obs_dim), jnp.float32)
    params = init_params(k_par, obs_dim, hidden_sizes)

    v = mlp_critic_forward(obs, params)
    jax.block_until_ready(v)
    assert v.shape == (B,)

    # Pure-JAX f32 reference (same math as the PyTorch module). The kernel feeds the MXU
    # bf16 inputs (and on v6e/v7x does bf16 bias+tanh), so use a loose tolerance.
    h = jnp.tanh(obs @ params["w1"] + params["b1"])
    h = jnp.tanh(h @ params["w2"] + params["b2"])
    v_f32 = jnp.squeeze(h @ params["w3"] + params["b3"], -1)
    assert jnp.allclose(v, v_f32, atol=5e-2, rtol=5e-2)

    # Path-matched reference mirroring the kernel's bf16-input / f32-accumulate dots and
    # whichever elementwise dtype the kernel selected for this chip generation.
    bf = jnp.bfloat16
    ew_bf16 = _supports_bf16_elementwise()

    def _act(pre_f32, bias):
        if ew_bf16:
            return jnp.tanh(pre_f32.astype(bf) + bias.astype(bf)).astype(bf)
        return jnp.tanh(pre_f32 + bias).astype(bf)

    hp = _act(jnp.dot(obs.astype(bf), params["w1"].astype(bf),
                      preferred_element_type=jnp.float32), params["b1"])
    hp = _act(jnp.dot(hp, params["w2"].astype(bf),
                      preferred_element_type=jnp.float32), params["b2"])
    v_pm = jnp.squeeze(jnp.dot(hp, params["w3"].astype(bf),
                               preferred_element_type=jnp.float32) + params["b3"], -1)
    assert jnp.allclose(v, v_pm, atol=1e-2, rtol=1e-2)

    print("KERNEL_OK")
</pallas_src>

<mosaic_0001>
module attributes {stable_mosaic.version = 11 : i64} {
  func.func @_mlp_critic_kernel(%arg0: i32, %arg1: memref<8x16xf32, #tpu.memory_space<vmem>>, %arg2: memref<32x16xbf16, #tpu.memory_space<vmem>>, %arg3: memref<32x1xf32, #tpu.memory_space<vmem>>, %arg4: memref<32x32xbf16, #tpu.memory_space<vmem>>, %arg5: memref<32x1xf32, #tpu.memory_space<vmem>>, %arg6: memref<1x32xbf16, #tpu.memory_space<vmem>>, %arg7: memref<1x1xf32, #tpu.memory_space<smem>>, %arg8: memref<1x8xf32, #tpu.memory_space<vmem>>) attributes {dimension_semantics = [#tpu.dimension_semantics<parallel>], iteration_bounds = array<i64: 1>, scalar_prefetch = 0 : i64, scratch_operands = 0 : i64, tpu.core_type = #tpu.core_type<tc>, window_params = [{transform_indices = @transform_0, window_bounds = array<i64: 8, 16>}, {pipeline_mode = #tpu.pipeline_mode<synchronous>, transform_indices = @transform_1, window_bounds = array<i64: 32, 16>}, {pipeline_mode = #tpu.pipeline_mode<synchronous>, transform_indices = @transform_2, window_bounds = array<i64: 32, 1>}, {pipeline_mode = #tpu.pipeline_mode<synchronous>, transform_indices = @transform_3, window_bounds = array<i64: 32, 32>}, {pipeline_mode = #tpu.pipeline_mode<synchronous>, transform_indices = @transform_4, window_bounds = array<i64: 32, 1>}, {pipeline_mode = #tpu.pipeline_mode<synchronous>, transform_indices = @transform_5, window_bounds = array<i64: 1, 32>}, {transform_indices = @transform_6, window_bounds = array<i64: 1, 1>}, {transform_indices = @transform_7, window_bounds = array<i64: 1, 8>}]} {
    %c0 = arith.constant 0 : index
    %c0_0 = arith.constant 0 : index
    %0 = vector.load %arg2[%c0, %c0_0] : memref<32x16xbf16, #tpu.memory_space<vmem>>, vector<32x16xbf16>
    %c0_1 = arith.constant 0 : index
    %c0_2 = arith.constant 0 : index
    %1 = vector.load %arg1[%c0_1, %c0_2] : memref<8x16xf32, #tpu.memory_space<vmem>>, vector<8x16xf32>
    %2 = arith.truncf %1 : vector<8x16xf32> to vector<8x16xbf16>
    %cst = arith.constant dense<0.000000e+00> : vector<32x8xf32>
    %3 = tpu.matmul %0, %2, %cst {dimension_numbers = #tpu.dot_dimension_numbers<[1], [1], [0], [0], [0, 0, 1, 0], [], []>} : vector<32x16xbf16>, vector<8x16xbf16>, vector<32x8xf32> -> vector<32x8xf32>
    %c0_3 = arith.constant 0 : index
    %c0_4 = arith.constant 0 : index
    %4 = vector.load %arg3[%c0_3, %c0_4] : memref<32x1xf32, #tpu.memory_space<vmem>>, vector<32x1xf32>
    %5 = vector.broadcast %4 : vector<32x1xf32> to vector<32x8xf32>
    %6 = arith.addf %3, %5 : vector<32x8xf32>
    %7 = math.tanh %6 : vector<32x8xf32>
    %8 = arith.truncf %7 : vector<32x8xf32> to vector<32x8xbf16>
    %c0_5 = arith.constant 0 : index
    %c0_6 = arith.constant 0 : index
    %9 = vector.load %arg4[%c0_5, %c0_6] : memref<32x32xbf16, #tpu.memory_space<vmem>>, vector<32x32xbf16>
    %cst_7 = arith.constant dense<0.000000e+00> : vector<32x8xf32>
    %10 = tpu.matmul %9, %8, %cst_7 {dimension_numbers = #tpu.dot_dimension_numbers<[1], [0], [0], [1], [0, 0, 1, 1], [], []>} : vector<32x32xbf16>, vector<32x8xbf16>, vector<32x8xf32> -> vector<32x8xf32>
    %c0_8 = arith.constant 0 : index
    %c0_9 = arith.constant 0 : index
    %11 = vector.load %arg5[%c0_8, %c0_9] : memref<32x1xf32, #tpu.memory_space<vmem>>, vector<32x1xf32>
    %12 = vector.broadcast %11 : vector<32x1xf32> to vector<32x8xf32>
    %13 = arith.addf %10, %12 : vector<32x8xf32>
    %14 = math.tanh %13 : vector<32x8xf32>
    %15 = arith.truncf %14 : vector<32x8xf32> to vector<32x8xbf16>
    %c0_10 = arith.constant 0 : index
    %c0_11 = arith.constant 0 : index
    %16 = vector.load %arg6[%c0_10, %c0_11] : memref<1x32xbf16, #tpu.memory_space<vmem>>, vector<1x32xbf16>
    %cst_12 = arith.constant dense<0.000000e+00> : vector<1x8xf32>
    %17 = tpu.matmul %16, %15, %cst_12 {dimension_numbers = #tpu.dot_dimension_numbers<[1], [0], [0], [1], [0, 0, 1, 1], [], []>} : vector<1x32xbf16>, vector<32x8xbf16>, vector<1x8xf32> -> vector<1x8xf32>
    %c0_13 = arith.constant 0 : index
    %c0_14 = arith.constant 0 : index
    %18 = memref.load %arg7[%c0_13, %c0_14] : memref<1x1xf32, #tpu.memory_space<smem>>
    %19 = vector.broadcast %18 : f32 to vector<1x8xf32>
    %20 = arith.addf %17, %19 : vector<1x8xf32>
    %c0_15 = arith.constant 0 : index
    %c0_16 = arith.constant 0 : index
    %21 = vector.load %arg8[%c0_15, %c0_16] : memref<1x8xf32, #tpu.memory_space<vmem>>, vector<1x8xf32>
    tpu.vector_store %arg8[%c0_15, %c0_16], %20 {strides = array<i32>} : memref<1x8xf32, #tpu.memory_space<vmem>>, vector<1x8xf32>,
    return
  }
  func.func @transform_0(%arg0: i32) -> (i32, i32) {
    %c0_i32 = arith.constant 0 : i32
    %c0_i32_0 = arith.constant 0 : i32
    return %arg0, %c0_i32 : i32, i32
  }
  func.func @transform_1(%arg0: i32) -> (i32, i32) {
    %c0_i32 = arith.constant 0 : i32
    %c0_i32_0 = arith.constant 0 : i32
    %c0_i32_1 = arith.constant 0 : i32
    return %c0_i32, %c0_i32_0 : i32, i32
  }
  func.func @transform_2(%arg0: i32) -> (i32, i32) {
    %c0_i32 = arith.constant 0 : i32
    %c0_i32_0 = arith.constant 0 : i32
    %c0_i32_1 = arith.constant 0 : i32
    return %c0_i32, %c0_i32_0 : i32, i32
  }
  func.func @transform_3(%arg0: i32) -> (i32, i32) {
    %c0_i32 = arith.constant 0 : i32
    %c0_i32_0 = arith.constant 0 : i32
    %c0_i32_1 = arith.constant 0 : i32
    return %c0_i32, %c0_i32_0 : i32, i32
  }
  func.func @transform_4(%arg0: i32) -> (i32, i32) {
    %c0_i32 = arith.constant 0 : i32
    %c0_i32_0 = arith.constant 0 : i32
    %c0_i32_1 = arith.constant 0 : i32
    return %c0_i32, %c0_i32_0 : i32, i32
  }
  func.func @transform_5(%arg0: i32) -> (i32, i32) {
    %c0_i32 = arith.constant 0 : i32
    %c0_i32_0 = arith.constant 0 : i32
    %c0_i32_1 = arith.constant 0 : i32
    return %c0_i32, %c0_i32_0 : i32, i32
  }
  func.func @transform_6(%arg0: i32) -> (i32, i32) {
    %c0_i32 = arith.constant 0 : i32
    %c0_i32_0 = arith.constant 0 : i32
    %c0_i32_1 = arith.constant 0 : i32
    return %c0_i32, %c0_i32_0 : i32, i32
  }
  func.func @transform_7(%arg0: i32) -> (i32, i32) {
    %c0_i32 = arith.constant 0 : i32
    %c0_i32_0 = arith.constant 0 : i32
    return %arg0, %c0_i32 : i32, i32
  }
}

</mosaic_0001>

<bundles_post_ra>
// kernel: tpu_custom_call.1
= control target key start
LH: loop header
LB: loop body
LE: loop exit
PB: predicated region body
PF: predicated region fallthrough
CT: control target
= control target key end

     0   :  { %vm69_vm0 = vcmask 130048   ;;  %v388_v3 = vmov 0   ;;  %s496_s0 = inlined_call_operand.vmem [shape: f32[8,16], index: 0, kind: input, shape index: {}]   ;;  %s497_s1 = inlined_call_operand.vmem [shape: bf16[32,16], index: 1, kind: input, shape index: {}]   ;;  %s498_s2 = inlined_call_operand.vmem [shape: f32[32,1], index: 2, kind: input, shape index: {}]   ;;  %s499_s3 = inlined_call_operand.vmem [shape: bf16[32,32], index: 3, kind: input, shape index: {}]   ;;  %s500_s4 = inlined_call_operand.vmem [shape: f32[32,1], index: 4, kind: input, shape index: {}]   ;;  %s501_s5 = inlined_call_operand.vmem [shape: bf16[1,32], index: 5, kind: input, shape index: {}]   ;;  %s502_s6 = inlined_call_operand.<no memory space> [shape: f32[1,1], index: 6, kind: input, shape index: {}]   ;;  %s503_s7 = inlined_call_operand.hbm [shape: f32[1,8], index: 7, kind: output, shape index: {}]  }
   0x1   :  { %v33_v0 = vld [vmem:[%s496_s0] sm:$0xff]  ;;  %342 = vset.pattern.permute.xlu0 %v388_v3  ;;  %343 = vset.pattern.permute.xlu1 %v388_v3  ;;  %v37_v5 = vld [vmem:[%s498_s2 + $0x10] sm:$0xff]  ;;  %v36_v7 = vld [vmem:[%s498_s2 + $0x8] sm:$0xff] }
   0x2   :  { %v34_v1 = vpack.c.bf16 %v33_v0, %v33_v0  ;;  %v344_v2 = vld [vmem:[%s497_s1] sm:$0xff]   ;;  %51 = vperm.xlu1 %343, %v37_v5   ;;  %v38_v8 = vld [vmem:[%s498_s2 + $0x18] sm:$0xff] }
   0x3   :  { %v35_v4 = vld [vmem:[%s498_s2] sm:$0xff]  ;;  %317 = vmatprep.mubr.msk.bf16.mxu0 %vm69_vm0, %v344_v2 }
   0x4   :  { %337 = vmatprep.subr.msk.bf16.mxu0 %vm69_vm0, %v34_v1  ;;  %v77_v6 = vsel %vm69_vm0, %v34_v1, 0  ;;  %41 = vperm.xlu0 %342, %v35_v4  }
   0x5   :  { %316 = vmatpush3.bf16.xpose.msra.mxu0 %v77_v6 }
   0x6   :  { %13 = vsyncpa [#allocation4], 0  ;;  %v345_v9 = vld [vmem:[%s497_s1 + $0x8] sm:$0xff]   ;;  %56 = vperm.xlu1 %343, %v38_v8   ;;  %v138_v10 = vld [vmem:[%s500_s4] sm:$0xff]  ;;  %vm172_vm1 = vcmask 261120   ;;  %v389_v34 = vmov 0.0   ;;  %v236_v54 = vstv %s502_s6 }
   0x7   :  { %v139_v11 = vld [vmem:[%s500_s4 + $0x8] sm:$0xff]  ;;  %v140_v12 = vld [vmem:[%s500_s4 + $0x10] sm:$0xff]  ;;  %v141_v13 = vld [vmem:[%s500_s4 + $0x18] sm:$0xff]  ;;  %329 = vmatprep.subr.bf16.mxu0 %v389_v34  ;;  %vm390_vm2 = vmmov 0   ;;  %s391_s26 = smov [#allocation3]   ;;  %vm280_vm3 = vcmask 57344  }
   0x8   :  { %46 = vperm.xlu0 %342, %v36_v7   ;;  %v346_v14 = vld [vmem:[%s499_s3] sm:$0xff]   ;;  %v347_v33 = vld [vmem:[%s499_s3 + $0x8] sm:$0xff]   ;;  %s288_s27 = sshll.u32 %s391_s26, 4  ;;  %s289_s27 = int_to_ptr.vmem [resolvable:$true] %s288_s27 }
   0x9   :  { %325 = vmatprep.mubr.msk.bf16.mxu1 %vm172_vm1, %v346_v14  ;;  %v234_v53 = vld [vmem:[%s501_s5] sm:$0x1]  ;;  %s364_s28 = scalar_lea.vmem %s289_s27, 16  ;;  %s368_s29 = scalar_lea.vmem %s289_s27, 32 }
   0xa   :  { %149 = vperm.xlu1 %343, %v139_v11   ;;  %p365_p0 = scmp.ne.s32.totalorder %s289_s27, %s364_s28  ;;  %p369_p1 = scmp.lt.s32.totalorder %s289_s27, %s289_s27 }
   0xb   :  { %p370_p2 = scmp.lt.s32.totalorder %s368_s29, %s364_s28 }
   0xc   :  { %318 = vmatmul.mubr.msk.bf16.vlgmr.msra.gmra.mrb[0].mxu0 %vm69_vm0, %v345_v9  ;;  %144 = vperm.xlu0 %342, %v138_v10  }
   0xd   :  { %333 = vmatprep.mubr.msk.bf16.mxu0 %vm390_vm2, %v389_v34  ;;  %p371_p3 = por %p370_p2, %p369_p1 }
   0xe   :  { %159 = vperm.xlu1 %343, %v141_v13  }
   0xf   :  { %p372_p4 = pnand %p371_p3, %p365_p0 }
  0x10   :  { %154 = vperm.xlu0 %342, %v140_v12  }
  0x81   :  { %v52_v15 = vpop.permute.xlu1 %51 }
  0x83   :  { %v42_v16 = vpop.permute.xlu0 %41 }
  0x85   :  { %v57_v20 = vpop.permute.xlu1 %56 }
  0x87   :  { %v47_v23 = vpop.permute.xlu0 %46 }
  0x89   :  { %v150_v36 = vpop.permute.xlu1 %149 }
  0x8b   :  { %v145_v35 = vpop.permute.xlu0 %144 }
  0x8d   :  { %v160_v41 = vpop.permute.xlu1 %159 }
  0x8f   :  { %v155_v37 = vpop.permute.xlu0 %154 }
  0xdf   :  { %v319_v17 = vpop.f32.mrb[0].mxu0 }
  0xe0   :  { %v122_v18 = vadd.f32 %v319_v17, %v52_v15  ;;  %v113_v19 = vpop.f32.mrb[1].mxu0 }
  0xe1   :  { %v114_v21 = vadd.f32 %v113_v19, %v42_v16  ;;  %v320_v22 = vpop.f32.mrb[2].mxu0 }
  0xe2   :  { %348 = vtanh.f32 %v122_v18  ;;  %v125_v24 = vadd.f32 %v320_v22, %v57_v20  ;;  %v116_v25 = vpop.f32.mrb[3].mxu0 }
  0xe3   :  { %350 = vtanh.f32 %v114_v21  ;;  %v117_v26 = vadd.f32 %v116_v25, %v47_v23 }
  0xe4   :  { %352 = vtanh.f32 %v125_v24 }
  0xe5   :  { %354 = vtanh.f32 %v117_v26 }
  0xec   :  { %v349_v27 = vpop.eup %348 }
  0xed   :  { %v351_v28 = vpop.eup %350 }
  0xee   :  { %v353_v29 = vpop.eup %352 }
  0xef   :  { %v355_v30 = vpop.eup %354  ;;  %v133_v31 = vpack.c.bf16 %v353_v29, %v349_v27 }
  0xf0   :  { %v132_v32 = vpack.c.bf16 %v355_v30, %v351_v28 }
  0xf2   :  { %321 = vmatprep.subr.bf16.mxu1 %v132_v32 }
  0xf3   :  { %322 = vmatpush3.bf16.msra.mxu1 %v132_v32 }
  0xf4   :  { %323 = vmatprep.subr.bf16.mxu1 %v133_v31 }
  0xf7   :  { %324 = vmatpush3.bf16.msra.mxu1 %v133_v31 }
  0xfa   :  { %326 = vmatmul.mubr.msk.bf16.vlgmr.msra.gmra.mrb[0].mxu1 %vm172_vm1, %v347_v33 }
 0x1cd   :  { %v327_v38 = vpop.f32.mrb[0].mxu1 }
 0x1ce   :  { %v222_v39 = vadd.f32 %v327_v38, %v155_v37  ;;  %v213_v40 = vpop.f32.mrb[1].mxu1 }
 0x1cf   :  { %v214_v42 = vadd.f32 %v213_v40, %v145_v35  ;;  %v328_v43 = vpop.f32.mrb[2].mxu1 }
 0x1d0   :  { %356 = vtanh.f32 %v222_v39  ;;  %v225_v44 = vadd.f32 %v328_v43, %v160_v41  ;;  %v216_v45 = vpop.f32.mrb[3].mxu1 }
 0x1d1   :  { %358 = vtanh.f32 %v214_v42  ;;  %v217_v46 = vadd.f32 %v216_v45, %v150_v36 }
 0x1d2   :  { %360 = vtanh.f32 %v225_v44 }
 0x1d3   :  { %362 = vtanh.f32 %v217_v46 }
 0x1da   :  { %v357_v47 = vpop.eup %356 }
 0x1db   :  { %v359_v48 = vpop.eup %358 }
 0x1dc   :  { %v361_v49 = vpop.eup %360 }
 0x1dd   :  { %v363_v50 = vpop.eup %362  ;;  %v233_v51 = vpack.c.bf16 %v361_v49, %v357_v47 }
 0x1de   :  { %v232_v52 = vpack.c.bf16 %v363_v50, %v359_v48 }
 0x1e0   :  { %330 = vmatpush3.bf16.msra.mxu0 %v232_v52 }
 0x1e1   :  { %331 = vmatprep.subr.bf16.mxu0 %v389_v34 }
 0x1e4   :  { %332 = vmatpush3.bf16.msra.mxu0 %v233_v51 }
 0x1e7   :  { %334 = vmatmul.mubr.msk.bf16.vlgmr.msra.gmra.mrb[4].mxu0 %vm172_vm1, %v234_v53 }
 0x2ba   :  { %v274_v55 = vpop.f32.mrb[4].mxu0 }
 0x2bb   :  { %v275_v56 = vadd.f32 %v274_v55, %v236_v54  ;;  %v335_v57 = vpop.f32.mrb[5].mxu0 }
 0x2bc   :  { %v277_v58 = vpop.f32.mrb[6].mxu0 }
 0x2bd   :  { %v336_v59 = vpop.f32.mrb[7].mxu0  ;;  %281 = vst.msk [vmem:[#allocation3] sm:$0x1] %vm280_vm3, %v275_v56 }
 0x2be   :  { %375 = shalt.err (!%p372_p4)
}
 0x2bf   :  { %s376_s30 = scalar_lea.hbm %s503_s7, 16 }
 0x2c0   :  { %p377_p5 = scmp.ne.s32.totalorder %s503_s7, %s376_s30  ;;  %p380_p6 = scmp.lt.u32.totalorder %s376_s30, %s503_s7 }
 0x2c2   :  { %p382_p7 = pnand %p380_p6, %p377_p5 }
 0x2c4   :  { %385 = shalt.err (!%p382_p7)
}
 0x2c5   :  { %291 = dma.vmem_to_hbm [thread:$0]  %s289_s27, 16, %s503_s7, [#allocation4]  }
 0x2c6   :  { %386 = dma.done.wait [#allocation4], 16  }
 0x2c7   :  { %387 = vsyncadd [#allocation4], 4294967280 }
 0x2c8   :  { %295 = vsyncpa [#allocation4], 1 }

</bundles_post_ra>
